<compile_context>
chip_gen: v5e
topology: v5e:2x2
jax: 0.10.0
libtpu: 0.0.40
codegen_flags: <defaults>
</compile_context>

<pallas_src>
import functools

import jax
import jax.numpy as jnp
from jax import lax
from jax.experimental import pallas as pl
from jax.experimental.pallas import tpu as pltpu

N_HIDDEN = 32
IN_DIM = 2
OUT_DIM = 2
N_HIDDEN_LAYERS = 6  # the six Linear(H,H) layers between the first and last


def _round_up(x, m):
    return (x + m - 1) // m * m


def _mlp_kernel(x_ref, w0_ref, b0_ref, wh_ref, bh_ref, wo_ref, bo_ref, o_ref,
                *, n_splits):
    """Full MLP on one batch tile, batch-on-lanes layout.

    x_ref:  (IN_DIM, tile_b)                        f32, batch on lanes
    w0_ref: (N_HIDDEN, IN_DIM)                      compute dtype (bf16 by default)
    b0_ref: (N_HIDDEN, 1)                           f32
    wh_ref: (N_HIDDEN_LAYERS, N_HIDDEN, N_HIDDEN)   compute dtype
    bh_ref: (N_HIDDEN_LAYERS, N_HIDDEN, 1)          f32
    wo_ref: (OUT_DIM, N_HIDDEN)                     compute dtype
    bo_ref: (OUT_DIM, 1)                            f32
    o_ref:  (OUT_DIM, tile_b)                       f32

    The tile is split into `n_splits` independent 128-aligned lane groups so the
    scheduler can overlap one group's MXU matmul with another group's EUP tanh.
    """
    cdt = w0_ref.dtype          # MXU operand dtype (bf16 by default)
    tb = x_ref.shape[1]
    sb = tb // n_splits

    w0 = w0_ref[...]
    b0 = b0_ref[...]            # (H,1): broadcasts over lanes (cheap VPU add)
    wo = wo_ref[...]
    bo = bo_ref[...]

    # First layer per lane group: (32,2) @ (2,sb) + (32,1) -> tanh (f32).
    hs = []
    for s in range(n_splits):
        x = x_ref[:, s * sb:(s + 1) * sb].astype(cdt)
        z = jnp.dot(w0, x, preferred_element_type=jnp.float32) + b0
        hs.append(jnp.tanh(z))

    # Six hidden layers, fully unrolled so the LLO scheduler sees the whole body;
    # the independent lane groups give it MXU / EUP work to interleave.
    def body(i, hs):
        w = wh_ref[i]                       # (32, 32), compute dtype
        b = bh_ref[i]                       # (32, 1) f32
        zs = [jnp.dot(w, h.astype(cdt), preferred_element_type=jnp.float32) + b
              for h in hs]
        return tuple(jnp.tanh(z) for z in zs)

    hs = lax.fori_loop(0, N_HIDDEN_LAYERS, body, tuple(hs), unroll=True)

    # Output layer: lane-dense (2, sb) stores on 128-aligned lane boundaries.
    for s in range(n_splits):
        out = jnp.dot(wo, hs[s].astype(cdt),
                      preferred_element_type=jnp.float32) + bo
        o_ref[:, s * sb:(s + 1) * sb] = out.astype(o_ref.dtype)


@functools.partial(jax.jit, static_argnames=("tile_b", "compute_dtype"))
def net_forward(x, params, tile_b=8192, compute_dtype=jnp.bfloat16):
    """x: (B, 2).  params = (w0, b0, wh, bh, wo, bo) in PyTorch (out, in) layout."""
    w0, b0, wh, bh, wo, bo = params
    B, F = x.shape
    assert F == IN_DIM

    # Batch-on-lanes: the tile must be a multiple of 128 lanes, clamped to the
    # (padded) batch.
    b128 = _round_up(B, 128)
    tb = min(_round_up(tile_b, 128), b128)
    # Keep >= 2 grid tiles whenever the batch allows it, so the "parallel" grid
    # axis can shard across both TensorCores on v7x instead of collapsing to
    # grid=(1,) for small/medium batches.
    if b128 >= 256:
        tb = min(tb, _round_up(-(-b128 // 2), 128))
    B_pad = _round_up(B, tb)
    # Split each tile into two independent 128-aligned lane groups when wide
    # enough so MXU matmul and EUP tanh of different groups can overlap.
    n_splits = 2 if tb % 256 == 0 else 1

    x_t = x.T  # (IN_DIM, B) -- layout plumbing outside the kernel
    if B_pad != B:
        x_t = jnp.pad(x_t, ((0, 0), (0, B_pad - B)))

    # bf16 MXU operands (native path on all generations); biases, accumulation
    # and tanh stay f32. Weight arrays are ~27 KB total, so the cast is free.
    w0c = w0.astype(compute_dtype)
    whc = wh.astype(compute_dtype)
    woc = wo.astype(compute_dtype)

    grid = (B_pad // tb,)
    # NOTE: the parameter BlockSpecs are grid-invariant; single-buffering them
    # (pipeline_mode=pl.Buffered(1)) would save ~27 KB of VMEM but the win is
    # negligible, so they are left on the default pipeline.
    in_specs = [
        pl.BlockSpec((IN_DIM, tb), lambda i: (0, i)),
        pl.BlockSpec(w0c.shape, lambda i: (0, 0)),
        pl.BlockSpec(b0.shape, lambda i: (0, 0)),
        pl.BlockSpec(whc.shape, lambda i: (0, 0, 0)),
        pl.BlockSpec(bh.shape, lambda i: (0, 0, 0)),
        pl.BlockSpec(woc.shape, lambda i: (0, 0)),
        pl.BlockSpec(bo.shape, lambda i: (0, 0)),
    ]
    out_spec = pl.BlockSpec((OUT_DIM, tb), lambda i: (0, i))

    out_t = pl.pallas_call(
        functools.partial(_mlp_kernel, n_splits=n_splits),
        out_shape=jax.ShapeDtypeStruct((OUT_DIM, B_pad), x.dtype),
        grid_spec=pltpu.PrefetchScalarGridSpec(
            num_scalar_prefetch=0,
            grid=grid,
            in_specs=in_specs,
            out_specs=out_spec,
        ),
        compiler_params=pltpu.CompilerParams(
            dimension_semantics=("parallel",),
        ),
    )(x_t, w0c, b0, whc, bh, woc, bo)

    return out_t[:, :B].T  # (B, OUT_DIM)


def init_params(key):
    """Deterministic init mimicking torch.nn.Linear default (+/- 1/sqrt(fan_in)).

    Weights are kept in PyTorch's (out_features, in_features) layout.
    Biases are stored as (out_features, 1) so they broadcast over the lane axis.
    """
    def linear(k, fan_in, fan_out):
        kw, kb = jax.random.split(k)
        bound = 1.0 / (fan_in ** 0.5)
        w = jax.random.uniform(kw, (fan_out, fan_in), jnp.float32, -bound, bound)
        b = jax.random.uniform(kb, (fan_out, 1), jnp.float32, -bound, bound)
        return w, b

    keys = jax.random.split(key, 2 + N_HIDDEN_LAYERS)
    w0, b0 = linear(keys[0], IN_DIM, N_HIDDEN)
    whs, bhs = [], []
    for i in range(N_HIDDEN_LAYERS):
        w, b = linear(keys[1 + i], N_HIDDEN, N_HIDDEN)
        whs.append(w)
        bhs.append(b)
    wh = jnp.stack(whs)  # (6, 32, 32)
    bh = jnp.stack(bhs)  # (6, 32, 1)
    wo, bo = linear(keys[-1], N_HIDDEN, OUT_DIM)
    return (w0, b0, wh, bh, wo, bo)


def reference_forward(x, params):
    """Pure-JAX f32 reference matching torch's nn.Sequential forward."""
    w0, b0, wh, bh, wo, bo = params
    h = jnp.tanh(x @ w0.T + b0[:, 0])
    for i in range(wh.shape[0]):
        h = jnp.tanh(h @ wh[i].T + bh[i, :, 0])
    return h @ wo.T + bo[:, 0]


def reference_forward_matched(x, params, compute_dtype=jnp.bfloat16):
    """Reference that applies the same bf16-operand casts as the kernel."""
    w0, b0, wh, bh, wo, bo = params

    def mm(a, w):  # a @ w.T with bf16 operands, f32 accumulate (MXU path)
        return jnp.dot(a.astype(compute_dtype), w.astype(compute_dtype).T,
                       preferred_element_type=jnp.float32)

    h = jnp.tanh(mm(x, w0) + b0[:, 0])
    for i in range(wh.shape[0]):
        h = jnp.tanh(mm(h, wh[i]) + bh[i, :, 0])
    return mm(h, wo) + bo[:, 0]


if __name__ == "__main__":
    key = jax.random.PRNGKey(0)
    key, kx1, kx2, kx3 = jax.random.split(key, 4)
    params = init_params(key)

    def check(x):
        out = jax.block_until_ready(net_forward(x, params))
        assert out.shape == (x.shape[0], OUT_DIM), out.shape
        ref_m = reference_forward_matched(x, params)
        ref_32 = reference_forward(x, params)
        # Tight check vs a reference that applies the same bf16 casts.
        assert jnp.allclose(out, ref_m, atol=2e-3, rtol=2e-3), (
            f"matched-ref max err {jnp.max(jnp.abs(out - ref_m))}"
        )
        # Looser check vs the pure-f32 reference (bf16 MXU operands).
        assert jnp.allclose(out, ref_32, atol=5e-2, rtol=5e-2), (
            f"f32-ref max err {jnp.max(jnp.abs(out - ref_32))}"
        )

    # Small batch of 2-D collocation points (t, x): two 128-lane "parallel"
    # tiles (exercises the >=2-tile clamp / both TCs on v7x).
    check(jax.random.normal(kx1, (256, IN_DIM), jnp.float32))
    # Ragged batch (B not a multiple of 128): padding path, single tile.
    check(jax.random.normal(kx2, (100, IN_DIM), jnp.float32))
    # Wider batch: 512-lane tiles, 2 grid tiles, 2-way lane-group split path.
    check(jax.random.normal(kx3, (1000, IN_DIM), jnp.float32))

    print("KERNEL_OK")
</pallas_src>

<mosaic_0001>
module attributes {stable_mosaic.version = 11 : i64} {
  func.func @_mlp_kernel(%arg0: i32, %arg1: memref<2x128xf32, #tpu.memory_space<vmem>>, %arg2: memref<32x2xbf16, #tpu.memory_space<vmem>>, %arg3: memref<32x1xf32, #tpu.memory_space<vmem>>, %arg4: memref<6x32x32xbf16, #tpu.memory_space<vmem>>, %arg5: memref<6x32x1xf32, #tpu.memory_space<vmem>>, %arg6: memref<2x32xbf16, #tpu.memory_space<vmem>>, %arg7: memref<2x1xf32, #tpu.memory_space<vmem>>, %arg8: memref<2x128xf32, #tpu.memory_space<vmem>>) attributes {dimension_semantics = [#tpu.dimension_semantics<parallel>], iteration_bounds = array<i64: 2>, scalar_prefetch = 0 : i64, scratch_operands = 0 : i64, tpu.core_type = #tpu.core_type<tc>, window_params = [{transform_indices = @transform_0, window_bounds = array<i64: 2, 128>}, {pipeline_mode = #tpu.pipeline_mode<synchronous>, transform_indices = @transform_1, window_bounds = array<i64: 32, 2>}, {pipeline_mode = #tpu.pipeline_mode<synchronous>, transform_indices = @transform_2, window_bounds = array<i64: 32, 1>}, {pipeline_mode = #tpu.pipeline_mode<synchronous>, transform_indices = @transform_3, window_bounds = array<i64: 6, 32, 32>}, {pipeline_mode = #tpu.pipeline_mode<synchronous>, transform_indices = @transform_4, window_bounds = array<i64: 6, 32, 1>}, {pipeline_mode = #tpu.pipeline_mode<synchronous>, transform_indices = @transform_5, window_bounds = array<i64: 2, 32>}, {pipeline_mode = #tpu.pipeline_mode<synchronous>, transform_indices = @transform_6, window_bounds = array<i64: 2, 1>}, {transform_indices = @transform_7, window_bounds = array<i64: 2, 128>}]} {
    %c0 = arith.constant 0 : index
    %c0_0 = arith.constant 0 : index
    %0 = vector.load %arg2[%c0, %c0_0] : memref<32x2xbf16, #tpu.memory_space<vmem>>, vector<32x2xbf16>
    %c0_1 = arith.constant 0 : index
    %c0_2 = arith.constant 0 : index
    %1 = vector.load %arg3[%c0_1, %c0_2] : memref<32x1xf32, #tpu.memory_space<vmem>>, vector<32x1xf32>
    %c0_3 = arith.constant 0 : index
    %c0_4 = arith.constant 0 : index
    %2 = vector.load %arg6[%c0_3, %c0_4] : memref<2x32xbf16, #tpu.memory_space<vmem>>, vector<2x32xbf16>
    %c0_5 = arith.constant 0 : index
    %c0_6 = arith.constant 0 : index
    %3 = vector.load %arg7[%c0_5, %c0_6] : memref<2x1xf32, #tpu.memory_space<vmem>>, vector<2x1xf32>
    %c0_7 = arith.constant 0 : index
    %c0_8 = arith.constant 0 : index
    %4 = vector.load %arg1[%c0_7, %c0_8] : memref<2x128xf32, #tpu.memory_space<vmem>>, vector<2x128xf32>
    %5 = arith.truncf %4 : vector<2x128xf32> to vector<2x128xbf16>
    %cst = arith.constant dense<0.000000e+00> : vector<32x128xf32>
    %6 = tpu.matmul %0, %5, %cst {dimension_numbers = #tpu.dot_dimension_numbers<[1], [0], [0], [1], [0, 0, 1, 1], [], []>} : vector<32x2xbf16>, vector<2x128xbf16>, vector<32x128xf32> -> vector<32x128xf32>
    %7 = vector.broadcast %1 : vector<32x1xf32> to vector<32x128xf32>
    %8 = arith.addf %6, %7 : vector<32x128xf32>
    %9 = math.tanh %8 : vector<32x128xf32>
    %c0_i32 = arith.constant 0 : i32
    %10 = arith.index_cast %c0_i32 : i32 to index
    %c0_9 = arith.constant 0 : index
    %c0_10 = arith.constant 0 : index
    %11 = vector.load %arg4[%10, %c0_9, %c0_10] : memref<6x32x32xbf16, #tpu.memory_space<vmem>>, vector<1x32x32xbf16>
    %12 = vector.shape_cast %11 : vector<1x32x32xbf16> to vector<32x32xbf16>
    %13 = arith.index_cast %c0_i32 : i32 to index
    %c0_11 = arith.constant 0 : index
    %c0_12 = arith.constant 0 : index
    %14 = vector.load %arg5[%13, %c0_11, %c0_12] : memref<6x32x1xf32, #tpu.memory_space<vmem>>, vector<1x32x1xf32>
    %15 = vector.shape_cast %14 : vector<1x32x1xf32> to vector<32x1xf32>
    %16 = arith.truncf %9 : vector<32x128xf32> to vector<32x128xbf16>
    %cst_13 = arith.constant dense<0.000000e+00> : vector<32x128xf32>
    %17 = tpu.matmul %12, %16, %cst_13 {dimension_numbers = #tpu.dot_dimension_numbers<[1], [0], [0], [1], [0, 0, 1, 1], [], []>} : vector<32x32xbf16>, vector<32x128xbf16>, vector<32x128xf32> -> vector<32x128xf32>
    %18 = vector.broadcast %15 : vector<32x1xf32> to vector<32x128xf32>
    %19 = arith.addf %17, %18 : vector<32x128xf32>
    %20 = math.tanh %19 : vector<32x128xf32>
    %c1_i32 = arith.constant 1 : i32
    %21 = arith.index_cast %c1_i32 : i32 to index
    %c0_14 = arith.constant 0 : index
    %c0_15 = arith.constant 0 : index
    %22 = vector.load %arg4[%21, %c0_14, %c0_15] : memref<6x32x32xbf16, #tpu.memory_space<vmem>>, vector<1x32x32xbf16>
    %23 = vector.shape_cast %22 : vector<1x32x32xbf16> to vector<32x32xbf16>
    %24 = arith.index_cast %c1_i32 : i32 to index
    %c0_16 = arith.constant 0 : index
    %c0_17 = arith.constant 0 : index
    %25 = vector.load %arg5[%24, %c0_16, %c0_17] : memref<6x32x1xf32, #tpu.memory_space<vmem>>, vector<1x32x1xf32>
    %26 = vector.shape_cast %25 : vector<1x32x1xf32> to vector<32x1xf32>
    %27 = arith.truncf %20 : vector<32x128xf32> to vector<32x128xbf16>
    %cst_18 = arith.constant dense<0.000000e+00> : vector<32x128xf32>
    %28 = tpu.matmul %23, %27, %cst_18 {dimension_numbers = #tpu.dot_dimension_numbers<[1], [0], [0], [1], [0, 0, 1, 1], [], []>} : vector<32x32xbf16>, vector<32x128xbf16>, vector<32x128xf32> -> vector<32x128xf32>
    %29 = vector.broadcast %26 : vector<32x1xf32> to vector<32x128xf32>
    %30 = arith.addf %28, %29 : vector<32x128xf32>
    %31 = math.tanh %30 : vector<32x128xf32>
    %c2_i32 = arith.constant 2 : i32
    %32 = arith.index_cast %c2_i32 : i32 to index
    %c0_19 = arith.constant 0 : index
    %c0_20 = arith.constant 0 : index
    %33 = vector.load %arg4[%32, %c0_19, %c0_20] : memref<6x32x32xbf16, #tpu.memory_space<vmem>>, vector<1x32x32xbf16>
    %34 = vector.shape_cast %33 : vector<1x32x32xbf16> to vector<32x32xbf16>
    %35 = arith.index_cast %c2_i32 : i32 to index
    %c0_21 = arith.constant 0 : index
    %c0_22 = arith.constant 0 : index
    %36 = vector.load %arg5[%35, %c0_21, %c0_22] : memref<6x32x1xf32, #tpu.memory_space<vmem>>, vector<1x32x1xf32>
    %37 = vector.shape_cast %36 : vector<1x32x1xf32> to vector<32x1xf32>
    %38 = arith.truncf %31 : vector<32x128xf32> to vector<32x128xbf16>
    %cst_23 = arith.constant dense<0.000000e+00> : vector<32x128xf32>
    %39 = tpu.matmul %34, %38, %cst_23 {dimension_numbers = #tpu.dot_dimension_numbers<[1], [0], [0], [1], [0, 0, 1, 1], [], []>} : vector<32x32xbf16>, vector<32x128xbf16>, vector<32x128xf32> -> vector<32x128xf32>
    %40 = vector.broadcast %37 : vector<32x1xf32> to vector<32x128xf32>
    %41 = arith.addf %39, %40 : vector<32x128xf32>
    %42 = math.tanh %41 : vector<32x128xf32>
    %c3_i32 = arith.constant 3 : i32
    %43 = arith.index_cast %c3_i32 : i32 to index
    %c0_24 = arith.constant 0 : index
    %c0_25 = arith.constant 0 : index
    %44 = vector.load %arg4[%43, %c0_24, %c0_25] : memref<6x32x32xbf16, #tpu.memory_space<vmem>>, vector<1x32x32xbf16>
    %45 = vector.shape_cast %44 : vector<1x32x32xbf16> to vector<32x32xbf16>
    %46 = arith.index_cast %c3_i32 : i32 to index
    %c0_26 = arith.constant 0 : index
    %c0_27 = arith.constant 0 : index
    %47 = vector.load %arg5[%46, %c0_26, %c0_27] : memref<6x32x1xf32, #tpu.memory_space<vmem>>, vector<1x32x1xf32>
    %48 = vector.shape_cast %47 : vector<1x32x1xf32> to vector<32x1xf32>
    %49 = arith.truncf %42 : vector<32x128xf32> to vector<32x128xbf16>
    %cst_28 = arith.constant dense<0.000000e+00> : vector<32x128xf32>
    %50 = tpu.matmul %45, %49, %cst_28 {dimension_numbers = #tpu.dot_dimension_numbers<[1], [0], [0], [1], [0, 0, 1, 1], [], []>} : vector<32x32xbf16>, vector<32x128xbf16>, vector<32x128xf32> -> vector<32x128xf32>
    %51 = vector.broadcast %48 : vector<32x1xf32> to vector<32x128xf32>
    %52 = arith.addf %50, %51 : vector<32x128xf32>
    %53 = math.tanh %52 : vector<32x128xf32>
    %c4_i32 = arith.constant 4 : i32
    %54 = arith.index_cast %c4_i32 : i32 to index
    %c0_29 = arith.constant 0 : index
    %c0_30 = arith.constant 0 : index
    %55 = vector.load %arg4[%54, %c0_29, %c0_30] : memref<6x32x32xbf16, #tpu.memory_space<vmem>>, vector<1x32x32xbf16>
    %56 = vector.shape_cast %55 : vector<1x32x32xbf16> to vector<32x32xbf16>
    %57 = arith.index_cast %c4_i32 : i32 to index
    %c0_31 = arith.constant 0 : index
    %c0_32 = arith.constant 0 : index
    %58 = vector.load %arg5[%57, %c0_31, %c0_32] : memref<6x32x1xf32, #tpu.memory_space<vmem>>, vector<1x32x1xf32>
    %59 = vector.shape_cast %58 : vector<1x32x1xf32> to vector<32x1xf32>
    %60 = arith.truncf %53 : vector<32x128xf32> to vector<32x128xbf16>
    %cst_33 = arith.constant dense<0.000000e+00> : vector<32x128xf32>
    %61 = tpu.matmul %56, %60, %cst_33 {dimension_numbers = #tpu.dot_dimension_numbers<[1], [0], [0], [1], [0, 0, 1, 1], [], []>} : vector<32x32xbf16>, vector<32x128xbf16>, vector<32x128xf32> -> vector<32x128xf32>
    %62 = vector.broadcast %59 : vector<32x1xf32> to vector<32x128xf32>
    %63 = arith.addf %61, %62 : vector<32x128xf32>
    %64 = math.tanh %63 : vector<32x128xf32>
    %c5_i32 = arith.constant 5 : i32
    %65 = arith.index_cast %c5_i32 : i32 to index
    %c0_34 = arith.constant 0 : index
    %c0_35 = arith.constant 0 : index
    %66 = vector.load %arg4[%65, %c0_34, %c0_35] : memref<6x32x32xbf16, #tpu.memory_space<vmem>>, vector<1x32x32xbf16>
    %67 = vector.shape_cast %66 : vector<1x32x32xbf16> to vector<32x32xbf16>
    %68 = arith.index_cast %c5_i32 : i32 to index
    %c0_36 = arith.constant 0 : index
    %c0_37 = arith.constant 0 : index
    %69 = vector.load %arg5[%68, %c0_36, %c0_37] : memref<6x32x1xf32, #tpu.memory_space<vmem>>, vector<1x32x1xf32>
    %70 = vector.shape_cast %69 : vector<1x32x1xf32> to vector<32x1xf32>
    %71 = arith.truncf %64 : vector<32x128xf32> to vector<32x128xbf16>
    %cst_38 = arith.constant dense<0.000000e+00> : vector<32x128xf32>
    %72 = tpu.matmul %67, %71, %cst_38 {dimension_numbers = #tpu.dot_dimension_numbers<[1], [0], [0], [1], [0, 0, 1, 1], [], []>} : vector<32x32xbf16>, vector<32x128xbf16>, vector<32x128xf32> -> vector<32x128xf32>
    %73 = vector.broadcast %70 : vector<32x1xf32> to vector<32x128xf32>
    %74 = arith.addf %72, %73 : vector<32x128xf32>
    %75 = math.tanh %74 : vector<32x128xf32>
    %c6_i32 = arith.constant 6 : i32
    %76 = arith.truncf %75 : vector<32x128xf32> to vector<32x128xbf16>
    %cst_39 = arith.constant dense<0.000000e+00> : vector<2x128xf32>
    %77 = tpu.matmul %2, %76, %cst_39 {dimension_numbers = #tpu.dot_dimension_numbers<[1], [0], [0], [1], [0, 0, 1, 1], [], []>} : vector<2x32xbf16>, vector<32x128xbf16>, vector<2x128xf32> -> vector<2x128xf32>
    %78 = vector.broadcast %3 : vector<2x1xf32> to vector<2x128xf32>
    %79 = arith.addf %77, %78 : vector<2x128xf32>
    %c0_40 = arith.constant 0 : index
    %c0_41 = arith.constant 0 : index
    %80 = vector.load %arg8[%c0_40, %c0_41] : memref<2x128xf32, #tpu.memory_space<vmem>>, vector<2x128xf32>
    tpu.vector_store %arg8[%c0_40, %c0_41], %79 {strides = array<i32>} : memref<2x128xf32, #tpu.memory_space<vmem>>, vector<2x128xf32>,
    return
  }
  func.func @transform_0(%arg0: i32) -> (i32, i32) {
    %c0_i32 = arith.constant 0 : i32
    %c0_i32_0 = arith.constant 0 : i32
    return %c0_i32, %arg0 : i32, i32
  }
  func.func @transform_1(%arg0: i32) -> (i32, i32) {
    %c0_i32 = arith.constant 0 : i32
    %c0_i32_0 = arith.constant 0 : i32
    %c0_i32_1 = arith.constant 0 : i32
    return %c0_i32, %c0_i32_0 : i32, i32
  }
  func.func @transform_2(%arg0: i32) -> (i32, i32) {
    %c0_i32 = arith.constant 0 : i32
    %c0_i32_0 = arith.constant 0 : i32
    %c0_i32_1 = arith.constant 0 : i32
    return %c0_i32, %c0_i32_0 : i32, i32
  }
  func.func @transform_3(%arg0: i32) -> (i32, i32, i32) {
    %c0_i32 = arith.constant 0 : i32
    %c0_i32_0 = arith.constant 0 : i32
    %c0_i32_1 = arith.constant 0 : i32
    %c0_i32_2 = arith.constant 0 : i32
    return %c0_i32, %c0_i32_0, %c0_i32_1 : i32, i32, i32
  }
  func.func @transform_4(%arg0: i32) -> (i32, i32, i32) {
    %c0_i32 = arith.constant 0 : i32
    %c0_i32_0 = arith.constant 0 : i32
    %c0_i32_1 = arith.constant 0 : i32
    %c0_i32_2 = arith.constant 0 : i32
    return %c0_i32, %c0_i32_0, %c0_i32_1 : i32, i32, i32
  }
  func.func @transform_5(%arg0: i32) -> (i32, i32) {
    %c0_i32 = arith.constant 0 : i32
    %c0_i32_0 = arith.constant 0 : i32
    %c0_i32_1 = arith.constant 0 : i32
    return %c0_i32, %c0_i32_0 : i32, i32
  }
  func.func @transform_6(%arg0: i32) -> (i32, i32) {
    %c0_i32 = arith.constant 0 : i32
    %c0_i32_0 = arith.constant 0 : i32
    %c0_i32_1 = arith.constant 0 : i32
    return %c0_i32, %c0_i32_0 : i32, i32
  }
  func.func @transform_7(%arg0: i32) -> (i32, i32) {
    %c0_i32 = arith.constant 0 : i32
    %c0_i32_0 = arith.constant 0 : i32
    return %c0_i32, %arg0 : i32, i32
  }
}

</mosaic_0001>

<bundles_post_ra>
// kernel: net_forward.1
= control target key start
LH: loop header
LB: loop body
LE: loop exit
PB: predicated region body
PF: predicated region fallthrough
CT: control target
= control target key end

     0   :  { %12 = vsyncpa [#allocation3], 0  ;;  %s1444_s0 = inlined_call_operand.vmem [shape: f32[2,256], index: 0, kind: input, shape index: {}]   ;;  %s1445_s1 = inlined_call_operand.vmem [shape: bf16[32,2], index: 1, kind: input, shape index: {}]   ;;  %s1446_s2 = inlined_call_operand.vmem [shape: f32[32,1], index: 2, kind: input, shape index: {}]   ;;  %s1447_s3 = inlined_call_operand.vmem [shape: bf16[6,32,32], index: 3, kind: input, shape index: {}]   ;;  %s1448_s4 = inlined_call_operand.vmem [shape: f32[6,32,1], index: 4, kind: input, shape index: {}]   ;;  %s1449_s5 = inlined_call_operand.vmem [shape: bf16[2,32], index: 5, kind: input, shape index: {}]   ;;  %s1450_s6 = inlined_call_operand.vmem [shape: f32[2,1], index: 6, kind: input, shape index: {}]   ;;  %s1451_s7 = inlined_call_operand.hbm [shape: f32[2,256], index: 7, kind: output, shape index: {}]  }
   0x1   :  { %14 = vsyncpa [#allocation3 + $0x1], 0  ;;  %s1214_s24 = smov 0   ;;  %s1216_s25 = smov 0  }
   0x2   :  { %s1218_s26 = smov 0   ;;  %s1220_s27 = smov 0  }
   0x3 LB: > { %s1235_s28 = sadd.s32 4294967295, %s1171_s27   ;;  %s875_s29 = sadd.s32 4294967294, %s1171_s27   ;;  %s1171_s27 = sphi %s1220_s27, %s1457_s27   ;;  %s1167_s26 = sphi %s1218_s26, %s1456_s26   ;;  %s1163_s25 = sphi %s1216_s25, %s1455_s25   ;;  %s1159_s24 = sphi %s1214_s24, %s1454_s24  }
   0x4   : > { %s1239_s30 = sadd.s32 1, %s1171_s27   ;;  %s179_s8 = sadd.s32 1, %s1167_s26 }
   0x5   : > { %s176_s9 = ssub.s32 %s1171_s27, %s1239_s30  ;;  %p189_p0 = scmp.ne.s32.totalorder %s1167_s26, %s1163_s25 }
   0x6   : > { %p177_p1 = scmp.eq.s32.totalorder %s176_s9, 0  ;;  %p190_p2 = scmp.eq.s32.totalorder %s1235_s28, 1 }
   0x7   : > { %p195_p3 = scmp.ne.s32.totalorder %s1163_s25, %s1159_s24  ;;  %p196_p4 = scmp.eq.s32.totalorder %s875_s29, 1 }
   0x8   : > { %s1250_s10 = scalar_select %p177_p1, %s1167_s26, %s179_s8  }
   0x9   : > { %p1252_p5 = por %p190_p2, %p189_p0  ;;  %p1256_p6 = por %p196_p4, %p195_p3 }
   0xa   : > { %p878_p7 = scmp.ge.s32.totalorder %s1171_s27, 1  ;;  %p239_p8 = scmp.lt.s32.totalorder %s1171_s27, 3 }
   0xc   : > { %p240_p9 = pnand %p878_p7, %p239_p8 }
   0xd   : > { %p270_p10 = scmp.lt.s32.totalorder (!%p240_p9), %s1235_s28, 1  ;;  %s267_s22 = sand.u32 (!%p240_p9), 1, %s1163_s25  }
   0xe   : > { %243 = sbr.rel (%p240_p9) target bundleno = 1364 (0x554), region = 48  ;;  %s993_s23 = sshll.u32 (!%p240_p9), %s1235_s28, 1 }
   0xf   : > { %s879_s29 = sshll.u32 (!%p240_p9), %s267_s22, 1  ;;  %s811_s13 = scalar_lea.hbm (!%p240_p9), %s1451_s7, %s993_s23 }
  0x10   : > { %s269_s14 = scalar_lea.vmem (!%p240_p9), [#allocation2], %s879_s29  ;;  %s815_s16 = sshll.u32 (!%p240_p9), %s811_s13, 4  ;;  %s816_s16 = int_to_ptr.hbm [resolvable:$true] %s815_s16 }
  0x11   : > { %s813_s15 = sshll.u32 (!%p240_p9), %s269_s14, 4  ;;  %s814_s15 = int_to_ptr.vmem [resolvable:$true] %s813_s15 }
  0x13   : > { %v281_v0 = vld [vmem:[%s1446_s2 + $0x10] sm:$0xff]  ;;  %v279_v1 = vld [vmem:[%s1446_s2] sm:$0xff]  ;;  %v1173_v2 = vmov 0   ;;  %s271_s17 = scalar_select %p270_p10, %s1235_s28, 1  ;;  %vm324_vm0 = vcmask 1040384   ;;  %v282_v4 = vld [vmem:[%s1446_s2 + $0x18] sm:$0xff] }
  0x14   : > { %1051 = vset.pattern.permute.xlu1 %v1173_v2  ;;  %1050 = vset.pattern.permute.xlu0 %v1173_v2  ;;  %v280_v5 = vld [vmem:[%s1446_s2 + $0x8] sm:$0xff]  ;;  %v996_v8 = vld [vmem:[%s1445_s1] sm:$0xff]  ;;  %vm317_vm1 = vcmask 15360   ;;  %v908_v11 = vld [vmem:[%s1448_s4 + $0x38] sm:$0xff]  ;;  %vm391_vm2 = vcmask 261120  }
  0x15   : > { %299 = vperm.xlu0 %1050, %v281_v0   ;;  %289 = vperm.xlu1 %1051, %v279_v1   ;;  %s880_s18 = sshll.u32 %s271_s17, 1  ;;  %v355_v9 = vld [vmem:[%s1448_s4] sm:$0xff]  ;;  %v356_v10 = vld [vmem:[%s1448_s4 + $0x8] sm:$0xff]  ;;  %v925_v14 = vld [vmem:[%s1448_s4 + $0x50] sm:$0xff]  ;;  %s801_s17 = scalar_lea.sflag [#allocation3], %s267_s22 }
  0x16   : > { %1052 = vset.pattern.permute.xlu2 %v1173_v2  ;;  %s273_s21 = scalar_lea.vmem %s1444_s0, %s880_s18  ;;  %v905_v12 = vld [vmem:[%s1448_s4 + $0x20] sm:$0xff]  ;;  %v997_v13 = vld [vmem:[%s1445_s1 + $0x8] sm:$0xff]  ;;  %v926_v15 = vld [vmem:[%s1448_s4 + $0x58] sm:$0xff]  ;;  %s1123_s18 = sshra.s32 %s816_s16, 4  ;;  %s1124_s18 = int_to_ptr.hbm [resolvable:$true] %s1123_s18 }
  0x17   : > { %v285_v3 = vld [vmem:[%s273_s21] sm:$0x3]  ;;  %v924_v16 = vld [vmem:[%s1448_s4 + $0x48] sm:$0xff]  ;;  %v943_v17 = vld [vmem:[%s1448_s4 + $0x70] sm:$0xff]  ;;  %s1125_s19 = scalar_lea.hbm %s1124_s18, 2  ;;  %s1129_s21 = scalar_lea.hbm %s1451_s7, 4 }
  0x18   : > { %v286_v6 = vpack.c.bf16 %v285_v3, %v285_v3  ;;  %v941_v18 = vld [vmem:[%s1448_s4 + $0x60] sm:$0xff]  ;;  %v942_v19 = vld [vmem:[%s1448_s4 + $0x68] sm:$0xff]  ;;  %v962_v20 = vld [vmem:[%s1448_s4 + $0x98] sm:$0xff]  ;;  %p1126_p11 = scmp.ne.s32.totalorder %s1124_s18, %s1125_s19  ;;  %p1130_p0 = scmp.lt.s32.totalorder %s1124_s18, %s1451_s7 }
  0x19   : > { %v959_v21 = vld [vmem:[%s1448_s4 + $0x80] sm:$0xff]  ;;  %v979_v22 = vld [vmem:[%s1448_s4 + $0xb0] sm:$0xff]  ;;  %v980_v23 = vld [vmem:[%s1448_s4 + $0xb8] sm:$0xff]  ;;  %p1131_p1 = scmp.lt.s32.totalorder %s1129_s21, %s1125_s19 }
  0x1a   : > { %v326_v7 = vsel %vm324_vm0, %v286_v6, 0  ;;  %v978_v24 = vld [vmem:[%s1448_s4 + $0xa8] sm:$0xff]  ;;  %v284_v25 = vld [vmem:[%s1450_s6] sm:$0x3]  ;;  %v357_v26 = vld [vmem:[%s1448_s4 + $0x10] sm:$0xff]  ;;  %p1127_p12 = pnand %p1126_p11, %p1252_p5 }
  0x1b   : > { %335 = vmatpush.bf16.msra.mxu0 %v326_v7  ;;  %373 = vperm.xlu2 %1052, %v357_v26   ;;  %v358_v28 = vld [vmem:[%s1448_s4 + $0x18] sm:$0xff]  ;;  %v907_v30 = vld [vmem:[%s1448_s4 + $0x30] sm:$0xff]  ;;  %v906_v34 = vld [vmem:[%s1448_s4 + $0x28] sm:$0xff]  ;;  %p1132_p2 = por %p1131_p1, %p1130_p0 }
  0x1c   : > { %v923_v42 = vld [vmem:[%s1448_s4 + $0x40] sm:$0xff]  ;;  %v944_v46 = vld [vmem:[%s1448_s4 + $0x78] sm:$0xff]  ;;  %v961_v51 = vld [vmem:[%s1448_s4 + $0x90] sm:$0xff]  ;;  %p1128_p13 = pneg %p1127_p12 }
  0x1d   : > { %304 = vperm.xlu0 %1050, %v282_v4   ;;  %294 = vperm.xlu1 %1051, %v280_v5   ;;  %v998_v50 = vld [vmem:[%s1447_s3] sm:$0xff]  ;;  %v960_v52 = vld [vmem:[%s1448_s4 + $0x88] sm:$0xff] }
  0x1e   : > { %889 = vmatmul.msk.bf16.vlgmr.msra.gmra.mxu0 %vm317_vm1, %v996_v8  ;;  %v999_v53 = vld [vmem:[%s1447_s3 + $0x8] sm:$0xff]  ;;  %v977_v54 = vld [vmem:[%s1448_s4 + $0xa0] sm:$0xff]  ;;  %p1133_p3 = pnand %p1132_p2, %p1128_p13 }
  0x23   : > { %378 = vperm.xlu2 %1052, %v358_v28  }
  0x25   : > { %363 = vperm.xlu0 %1050, %v355_v9   ;;  %368 = vperm.xlu1 %1051, %v356_v10   ;;  %v1000_v9 = vld [vmem:[%s1447_s3 + $0x10] sm:$0xff]  ;;  %v1001_v10 = vld [vmem:[%s1447_s3 + $0x18] sm:$0xff] }
  0x2b   : > { %445 = vperm.xlu2 %1052, %v907_v30   ;;  %v1003_v30 = vld [vmem:[%s1447_s3 + $0x28] sm:$0xff] }
  0x2d   : > { %450 = vperm.xlu0 %1050, %v908_v11   ;;  %435 = vperm.xlu1 %1051, %v905_v12  }
  0x2e   : > { %890 = vmatmul.msk.bf16.gmra.mxu0 %vm317_vm1, %v997_v13 }
  0x33   : > { %440 = vperm.xlu2 %1052, %v906_v34  }
  0x35   : > { %516 = vperm.xlu0 %1050, %v925_v14   ;;  %521 = vperm.xlu1 %1051, %v926_v15  }
  0x3b   : > { %506 = vperm.xlu2 %1052, %v923_v42  }
  0x3d   : > { %511 = vperm.xlu0 %1050, %v924_v16   ;;  %587 = vperm.xlu1 %1051, %v943_v17  }
  0x43   : > { %592 = vperm.xlu2 %1052, %v944_v46  }
  0x45   : > { %577 = vperm.xlu0 %1050, %v941_v18   ;;  %582 = vperm.xlu1 %1051, %v942_v19  }
  0x4b   : > { %658 = vperm.xlu2 %1052, %v961_v51  }
  0x4d   : > { %663 = vperm.xlu0 %1050, %v962_v20   ;;  %648 = vperm.xlu1 %1051, %v959_v21  }
  0x53   : > { %653 = vperm.xlu2 %1052, %v960_v52  }
  0x55   : > { %729 = vperm.xlu0 %1050, %v979_v22   ;;  %734 = vperm.xlu1 %1051, %v980_v23  }
  0x5b   : > { %719 = vperm.xlu2 %1052, %v977_v54  }
  0x5d   : > { %724 = vperm.xlu0 %1050, %v978_v24   ;;  %780 = vperm.xlu1 %1051, %v284_v25  }
  0x75   : > { %v374_v57 = vpop.permute.xlu2 %373 }
  0x7d   : > { %v379_v61 = vpop.permute.xlu2 %378 }
  0x85   : > { %v446_v13 = vpop.permute.xlu2 %445 }
  0x87   : > { %v300_v31 = vpop.permute.xlu0 %299  ;;  %v290_v32 = vpop.permute.xlu1 %289 }
  0x8d   : > { %v441_v17 = vpop.permute.xlu2 %440 }
  0x8f   : > { %v305_v36 = vpop.permute.xlu0 %304  ;;  %v295_v37 = vpop.permute.xlu1 %294 }
  0x97   : > { %v369_v60 = vpop.permute.xlu1 %368  ;;  %v364_v1 = vpop.permute.xlu0 %363 }
  0x9b   : > { %v337_v27 = vpop.f32.mrf.mxu0 }
  0x9c   : > { %v338_v41 = vadd.f32 %v337_v27, %v290_v32 }
  0x9f   : > { %v451_v16 = vpop.permute.xlu0 %450  ;;  %v436_v21 = vpop.permute.xlu1 %435 }
  0xa3   : > { %v339_v29 = vpop.f32.mrf.mxu0 }
  0xa4   : > { %v340_v39 = vadd.f32 %v339_v29, %v295_v37  ;;  %v1002_v29 = vld [vmem:[%s1447_s3 + $0x20] sm:$0xff] }
  0xab   : > { %v342_v33 = vpop.f32.mrf.mxu0 }
  0xac   : > { %v343_v35 = vadd.f32 %v342_v33, %v300_v31  ;;  %v517_v33 = vpop.permute.xlu0 %516 }
  0xae   : > { %1053 = vtanh.f32 %v343_v35 }
  0xb3   : > { %v344_v38 = vpop.f32.mrf.mxu0 }
  0xb4   : > { %v345_v40 = vadd.f32 %v344_v38, %v305_v36  ;;  %v1054_v43 = vpop.eup %1053  ;;  %v522_v36 = vpop.permute.xlu1 %521 }
  0xb5   : > { %v512_v37 = vpop.permute.xlu0 %511 }
  0xb6   : > { %1055 = vtanh.f32 %v345_v40 }
  0xb7   : > { %1057 = vtanh.f32 %v340_v39 }
  0xb8   : > { %1059 = vtanh.f32 %v338_v41  ;;  %v507_v41 = vpop.permute.xlu2 %506 }
  0xbc   : > { %v1056_v44 = vpop.eup %1055 }
  0xbd   : > { %v360_v45 = vpack.c.bf16 %v1056_v44, %v1054_v43  ;;  %v1058_v47 = vpop.eup %1057 }
  0xbe   : > { %v1060_v48 = vpop.eup %1059 }
  0xbf   : > { %404 = vmatpush.bf16.msra.mxu1 %v360_v45  ;;  %v359_v49 = vpack.c.bf16 %v1058_v47, %v1060_v48 }
  0xc3   : > { %405 = vmatpush.bf16.msra.mxu1 %v359_v49  ;;  %v1004_v49 = vld [vmem:[%s1447_s3 + $0x30] sm:$0xff] }
  0xc6   : > { %899 = vmatmul.msk.bf16.vlgmr.msra.gmra.mxu1 %vm391_vm2, %v998_v50  ;;  %v1005_v50 = vld [vmem:[%s1447_s3 + $0x38] sm:$0xff] }
  0xd6   : > { %900 = vmatmul.msk.bf16.gmra.mxu1 %vm391_vm2, %v999_v53  ;;  %v588_v53 = vpop.permute.xlu1 %587 }
 0x143   : > { %v407_v55 = vpop.f32.mrf.mxu1 }
 0x144   : > { %v408_v2 = vadd.f32 %v407_v55, %v364_v1 }
 0x14b   : > { %v409_v56 = vpop.f32.mrf.mxu1 }
 0x14c   : > { %v410_v63 = vadd.f32 %v409_v56, %v369_v60  ;;  %v583_v56 = vpop.permute.xlu1 %582 }
 0x153   : > { %v412_v58 = vpop.f32.mrf.mxu1 }
 0x154   : > { %v413_v59 = vadd.f32 %v412_v58, %v374_v57  ;;  %v593_v57 = vpop.permute.xlu2 %592 }
 0x156   : > { %1061 = vtanh.f32 %v413_v59 }
 0x15b   : > { %v414_v62 = vpop.f32.mrf.mxu1 }
 0x15c   : > { %v415_v0 = vadd.f32 %v414_v62, %v379_v61  ;;  %v1062_v3 = vpop.eup %1061  ;;  %v578_v61 = vpop.permute.xlu0 %577 }
 0x15e   : > { %1063 = vtanh.f32 %v415_v0 }
 0x15f   : > { %1065 = vtanh.f32 %v410_v63 }
 0x160   : > { %1067 = vtanh.f32 %v408_v2 }
 0x164   : > { %v1064_v4 = vpop.eup %1063 }
 0x165   : > { %v432_v5 = vpack.c.bf16 %v1064_v4, %v1062_v3  ;;  %v1066_v6 = vpop.eup %1065 }
 0x166   : > { %v1068_v7 = vpop.eup %1067 }
 0x167   : > { %475 = vmatpush.bf16.msra.mxu2 %v432_v5  ;;  %v431_v8 = vpack.c.bf16 %v1066_v6, %v1068_v7  ;;  %v1006_v5 = vld [vmem:[%s1447_s3 + $0x40] sm:$0xff]  ;;  %v1007_v6 = vld [vmem:[%s1447_s3 + $0x48] sm:$0xff] }
 0x16b   : > { %476 = vmatpush.bf16.msra.mxu2 %v431_v8 }
 0x16e   : > { %917 = vmatmul.msk.bf16.vlgmr.msra.gmra.mxu2 %vm391_vm2, %v1000_v9  ;;  %v659_v9 = vpop.permute.xlu2 %658 }
 0x17e   : > { %918 = vmatmul.msk.bf16.gmra.mxu2 %vm391_vm2, %v1001_v10 }
 0x1f1   : > { %v478_v11 = vpop.f32.mrf.mxu2 }
 0x1f2   : > { %v479_v22 = vadd.f32 %v478_v11, %v436_v21 }
 0x1f9   : > { %v480_v12 = vpop.f32.mrf.mxu2 }
 0x1fa   : > { %v481_v19 = vadd.f32 %v480_v12, %v441_v17  ;;  %v664_v12 = vpop.permute.xlu0 %663  ;;  %v649_v17 = vpop.permute.xlu1 %648 }
 0x201   : > { %v483_v14 = vpop.f32.mrf.mxu2 }
 0x202   : > { %v484_v15 = vadd.f32 %v483_v14, %v446_v13  ;;  %v654_v13 = vpop.permute.xlu2 %653 }
 0x204   : > { %1069 = vtanh.f32 %v484_v15 }
 0x209   : > { %v485_v18 = vpop.f32.mrf.mxu2 }
 0x20a   : > { %v486_v20 = vadd.f32 %v485_v18, %v451_v16  ;;  %v1070_v23 = vpop.eup %1069 }
 0x20c   : > { %1071 = vtanh.f32 %v486_v20 }
 0x20d   : > { %1073 = vtanh.f32 %v481_v19 }
 0x20e   : > { %1075 = vtanh.f32 %v479_v22 }
 0x212   : > { %v1072_v24 = vpop.eup %1071 }
 0x213   : > { %v503_v25 = vpack.c.bf16 %v1072_v24, %v1070_v23  ;;  %v1074_v26 = vpop.eup %1073 }
 0x214   : > { %v1076_v27 = vpop.eup %1075 }
 0x215   : > { %546 = vmatpush.bf16.msra.mxu3 %v503_v25  ;;  %v502_v28 = vpack.c.bf16 %v1074_v26, %v1076_v27  ;;  %v1008_v25 = vld [vmem:[%s1447_s3 + $0x50] sm:$0xff]  ;;  %v1009_v26 = vld [vmem:[%s1447_s3 + $0x58] sm:$0xff] }
 0x219   : > { %547 = vmatpush.bf16.msra.mxu3 %v502_v28 }
 0x21c   : > { %935 = vmatmul.msk.bf16.vlgmr.msra.gmra.mxu3 %vm391_vm2, %v1002_v29  ;;  %v730_v29 = vpop.permute.xlu0 %729 }
 0x22c   : > { %936 = vmatmul.msk.bf16.gmra.mxu3 %vm391_vm2, %v1003_v30 }
 0x29f   : > { %v549_v31 = vpop.f32.mrf.mxu3 }
 0x2a0   : > { %v550_v42 = vadd.f32 %v549_v31, %v507_v41 }
 0x2a7   : > { %v551_v32 = vpop.f32.mrf.mxu3 }
 0x2a8   : > { %v552_v39 = vadd.f32 %v551_v32, %v512_v37  ;;  %v735_v32 = vpop.permute.xlu1 %734  ;;  %v720_v37 = vpop.permute.xlu2 %719 }
 0x2af   : > { %v554_v34 = vpop.f32.mrf.mxu3 }
 0x2b0   : > { %v555_v35 = vadd.f32 %v554_v34, %v517_v33  ;;  %v725_v33 = vpop.permute.xlu0 %724 }
 0x2b2   : > { %1077 = vtanh.f32 %v555_v35 }
 0x2b7   : > { %v556_v38 = vpop.f32.mrf.mxu3 }
 0x2b8   : > { %v557_v40 = vadd.f32 %v556_v38, %v522_v36  ;;  %v1078_v43 = vpop.eup %1077 }
 0x2ba   : > { %1079 = vtanh.f32 %v557_v40 }
 0x2bb   : > { %1081 = vtanh.f32 %v552_v39 }
 0x2bc   : > { %1083 = vtanh.f32 %v550_v42 }
 0x2c0   : > { %v1080_v44 = vpop.eup %1079 }
 0x2c1   : > { %v574_v45 = vpack.c.bf16 %v1080_v44, %v1078_v43  ;;  %v1082_v46 = vpop.eup %1081 }
 0x2c2   : > { %v1084_v47 = vpop.eup %1083 }
 0x2c3   : > { %617 = vmatpush.bf16.msrb.mxu0 %v574_v45  ;;  %v573_v48 = vpack.c.bf16 %v1082_v46, %v1084_v47  ;;  %v283_v45 = vld [vmem:[%s1449_s5] sm:$0x1]  ;;  %v781_v46 = vpop.permute.xlu1 %780 }
 0x2c7   : > { %618 = vmatpush.bf16.msrb.mxu0 %v573_v48 }
 0x2ca   : > { %953 = vmatmul.msk.bf16.vlgmr.msrb.gmra.mxu0 %vm391_vm2, %v1004_v49 }
 0x2da   : > { %954 = vmatmul.msk.bf16.gmra.mxu0 %vm391_vm2, %v1005_v50 }
 0x347   : > { %v620_v51 = vpop.f32.mrf.mxu0 }
 0x348   : > { %v621_v62 = vadd.f32 %v620_v51, %v578_v61 }
 0x34f   : > { %v622_v52 = vpop.f32.mrf.mxu0 }
 0x350   : > { %v623_v59 = vadd.f32 %v622_v52, %v583_v56 }
 0x357   : > { %v625_v54 = vpop.f32.mrf.mxu0 }
 0x358   : > { %v626_v55 = vadd.f32 %v625_v54, %v588_v53 }
 0x35a   : > { %1085 = vtanh.f32 %v626_v55 }
 0x35f   : > { %v627_v58 = vpop.f32.mrf.mxu0 }
 0x360   : > { %v628_v60 = vadd.f32 %v627_v58, %v593_v57  ;;  %v1086_v63 = vpop.eup %1085 }
 0x362   : > { %1087 = vtanh.f32 %v628_v60 }
 0x363   : > { %1089 = vtanh.f32 %v623_v59 }
 0x364   : > { %1091 = vtanh.f32 %v621_v62 }
 0x368   : > { %v1088_v0 = vpop.eup %1087 }
 0x369   : > { %v645_v1 = vpack.c.bf16 %v1088_v0, %v1086_v63  ;;  %v1090_v2 = vpop.eup %1089 }
 0x36a   : > { %v1092_v3 = vpop.eup %1091 }
 0x36b   : > { %688 = vmatpush.bf16.msrb.mxu1 %v645_v1  ;;  %v644_v4 = vpack.c.bf16 %v1090_v2, %v1092_v3 }
 0x36f   : > { %689 = vmatpush.bf16.msrb.mxu1 %v644_v4 }
 0x372   : > { %971 = vmatmul.msk.bf16.vlgmr.msrb.gmra.mxu1 %vm391_vm2, %v1006_v5 }
 0x382   : > { %972 = vmatmul.msk.bf16.gmra.mxu1 %vm391_vm2, %v1007_v6 }
 0x3ef   : > { %v691_v7 = vpop.f32.mrf.mxu1 }
 0x3f0   : > { %v692_v18 = vadd.f32 %v691_v7, %v649_v17 }
 0x3f7   : > { %v693_v8 = vpop.f32.mrf.mxu1 }
 0x3f8   : > { %v694_v15 = vadd.f32 %v693_v8, %v654_v13 }
 0x3ff   : > { %v696_v10 = vpop.f32.mrf.mxu1 }
 0x400   : > { %v697_v11 = vadd.f32 %v696_v10, %v659_v9 }
 0x402   : > { %1093 = vtanh.f32 %v697_v11 }
 0x407   : > { %v698_v14 = vpop.f32.mrf.mxu1 }
 0x408   : > { %v699_v16 = vadd.f32 %v698_v14, %v664_v12  ;;  %v1094_v19 = vpop.eup %1093 }
 0x40a   : > { %1095 = vtanh.f32 %v699_v16 }
 0x40b   : > { %1097 = vtanh.f32 %v694_v15 }
 0x40c   : > { %1099 = vtanh.f32 %v692_v18 }
 0x410   : > { %v1096_v20 = vpop.eup %1095 }
 0x411   : > { %v716_v21 = vpack.c.bf16 %v1096_v20, %v1094_v19  ;;  %v1098_v22 = vpop.eup %1097 }
 0x412   : > { %v1100_v23 = vpop.eup %1099 }
 0x413   : > { %759 = vmatpush.bf16.msrb.mxu2 %v716_v21  ;;  %v715_v24 = vpack.c.bf16 %v1098_v22, %v1100_v23 }
 0x417   : > { %760 = vmatpush.bf16.msrb.mxu2 %v715_v24 }
 0x41a   : > { %989 = vmatmul.msk.bf16.vlgmr.msrb.gmra.mxu2 %vm391_vm2, %v1008_v25 }
 0x42a   : > { %990 = vmatmul.msk.bf16.gmra.mxu2 %vm391_vm2, %v1009_v26 }
 0x49d   : > { %v762_v27 = vpop.f32.mrf.mxu2 }
 0x49e   : > { %v763_v38 = vadd.f32 %v762_v27, %v720_v37 }
 0x4a5   : > { %v764_v28 = vpop.f32.mrf.mxu2 }
 0x4a6   : > { %v765_v35 = vadd.f32 %v764_v28, %v725_v33 }
 0x4ad   : > { %v767_v30 = vpop.f32.mrf.mxu2 }
 0x4ae   : > { %v768_v31 = vadd.f32 %v767_v30, %v730_v29 }
 0x4b0   : > { %1101 = vtanh.f32 %v768_v31 }
 0x4b5   : > { %v769_v34 = vpop.f32.mrf.mxu2 }
 0x4b6   : > { %v770_v36 = vadd.f32 %v769_v34, %v735_v32  ;;  %v1102_v39 = vpop.eup %1101 }
 0x4b8   : > { %1103 = vtanh.f32 %v770_v36 }
 0x4b9   : > { %1105 = vtanh.f32 %v765_v35 }
 0x4ba   : > { %1107 = vtanh.f32 %v763_v38 }
 0x4be   : > { %v1104_v40 = vpop.eup %1103 }
 0x4bf   : > { %v777_v41 = vpack.c.bf16 %v1104_v40, %v1102_v39  ;;  %v1106_v42 = vpop.eup %1105 }
 0x4c0   : > { %v1108_v43 = vpop.eup %1107 }
 0x4c1   : > { %792 = vmatpush.bf16.msrb.mxu3 %v777_v41  ;;  %v776_v44 = vpack.c.bf16 %v1106_v42, %v1108_v43 }
 0x4c5   : > { %793 = vmatpush.bf16.msrb.mxu3 %v776_v44 }
 0x4c8   : > { %991 = vmatmul.msk.bf16.vlgmr.msrb.gmra.mxu3 %vm391_vm2, %v283_v45 }
 0x54b   : > { %v795_v47 = vpop.f32.mrf.mxu3 }
 0x54c   : > { %v796_v48 = vadd.f32 %v795_v47, %v781_v46 }
 0x54e   : > { %799 = vst [vmem:[%s269_s14] sm:$0x3] %v796_v48 }
 0x54f   : > { %1136 = shalt.err (!%p1133_p3)
}
 0x550   : > { %1010 = dma.vmem_to_hbm [thread:$0]  (%p1252_p5), %s814_s15, 32, %s816_s16, %s801_s17  }
 0x553   : > { %v797_v49 = vpop.f32.mrf.mxu3 }
 0x554 PF: > { %p1016_p4 = scmp.ge.s32.totalorder %s1171_s27, 2  ;;  %s827_s22 = sand.u32 1, %s1159_s24  }
 0x555   : > { %s828_s8 = scalar_lea.sflag [#allocation3], %s827_s22 }
 0x556   : > { %p1013_p7 = pnand %p1016_p4, %p1256_p6 }
 0x558   : > { %p1014_p8 = pneg %p1013_p7 }
 0x55a   : > { %1154 = dma.done.wait (%p1014_p8), %s828_s8, 32  }
 0x55b   : > { %1156 = vsyncadd (%p1014_p8), %s828_s8, 4294967264  ;;  %p17_p9 = scmp.ge.s32.totalorder %s1239_s30, 4   ;;  %s1454_s24 = smov %s1163_s25 }
 0x55c   : > { %s1455_s25 = smov %s1167_s26  ;;  %s1456_s26 = smov %s1250_s10 }
 0x55d   : > { %s1457_s27 = smov %s1239_s30  ;;  %19 = sbr.rel (!%p17_p9) target bundleno = 3 (0x3), region = 93 }
 0x562   :  { %834 = vsyncpa [#allocation3], 1 }
 0x563   :  { %836 = vsyncpa [#allocation3 + $0x1], 1 }

</bundles_post_ra>
